<compile_context>
chip_gen: v5e
topology: v5e:2x2
jax: 0.10.0
libtpu: 0.0.40
codegen_flags: <defaults>
</compile_context>

<pallas_src>
import numpy as np
import jax
import jax.numpy as jnp
from jax.experimental import pallas as pl
from jax.experimental.pallas import tpu as pltpu

# ------------------------------------------------------------------ config ---
TOKENS = ["<PAD>"] + [chr(ord("A") + i) for i in range(24)]   # 25 tokens
PAD_TOKEN = "<PAD>"
PAD_IDX = TOKENS.index(PAD_TOKEN)
VOCAB = len(TOKENS)
VPAD_OUT = 32       # per-position padded vocab width (L*32 = 512 lanes, multiple of 128)

EMB_DIM = 5         # emb_dim
HID = 8             # base_hidden_dim (small)
LATENT = 16         # latent_dim (small)
SEQ_LEN = 16        # max_length (must be divisible by 4)
BATCH = 2
K = 7               # conv kernel size
assert SEQ_LEN % 4 == 0


# ------------------------------------------------------------ fused kernel ---
def _cae_fused_kernel(ids_ref, bc_ref, tok_ref, embop_ref, avg_ref, lng_ref, lnb_ref,
                      w1_ref, b1_ref, w2_ref, b2_ref, w3_ref, b3_ref,
                      wbn_ref, bbn_ref,
                      w4_ref, b4_ref, w5_ref, b5_ref, w6_ref, b6_ref,
                      wop_ref, bop_ref, out_ref):
    f32 = jnp.float32

    def dense(x, w_ref, b_ref, relu=True):
        y = jnp.dot(x, w_ref[...], preferred_element_type=f32) + b_ref[...]
        return jnp.maximum(y, 0.0) if relu else y

    # --- embedding: broadcast ids across vocab lanes (one dot), one-hot compare,
    #     then one dot with the block-diagonal embedding operator. ---
    ids = ids_ref[0].astype(f32)                                       # (1, L)
    idb = jnp.dot(ids, bc_ref[...], preferred_element_type=f32)        # (1, L*V)
    onehot = (jnp.abs(idb - tok_ref[...]) < 0.5).astype(f32)           # (1, L*V)
    emb = jnp.dot(onehot, embop_ref[...], preferred_element_type=f32)  # (1, L*E)

    # --- LayerNorm over each E-wide position block (block-averaging matmuls) ---
    mu = jnp.dot(emb, avg_ref[...], preferred_element_type=f32)
    cen = emb - mu
    var = jnp.dot(cen * cen, avg_ref[...], preferred_element_type=f32)
    x = cen * jax.lax.rsqrt(var + 1e-5) * lng_ref[...] + lnb_ref[...]  # (1, L*E)

    # --- encoder convs -> folded FC bottleneck -> decoder transposed convs ---
    x = dense(x, w1_ref, b1_ref)            # (1, L/2 * H)
    x = dense(x, w2_ref, b2_ref)            # (1, L/4 * 2H)
    x = dense(x, w3_ref, b3_ref)            # (1, L/4 * 4H)
    x = dense(x, wbn_ref, bbn_ref, relu=False)   # folded encoder_fc @ decoder_fc
    x = dense(x, w4_ref, b4_ref)            # (1, L/4 * 2H)
    x = dense(x, w5_ref, b5_ref)            # (1, L/2 * H)
    x = dense(x, w6_ref, b6_ref)            # (1, L * E)

    # --- output projection, lane-dense (VPAD_OUT lanes per position) ---
    out_ref[0] = dense(x, wop_ref, bop_ref, relu=False)                # (1, L*VPAD_OUT)


# ---------------------------------------------------- init-time preparation --
def _conv_dense(w_pt, lin, stride, pad):
    """Conv1d folded into a dense (Lin*Cin, Lout*Cout) operator."""
    cout, cin, k = w_pt.shape                       # PyTorch (Cout, Cin, K)
    lout = (lin + 2 * pad - k) // stride + 1
    W = np.zeros((lin * cin, lout * cout), np.float32)
    for i in range(lout):
        for kk in range(k):
            l = i * stride + kk - pad
            if 0 <= l < lin:
                W[l * cin:(l + 1) * cin, i * cout:(i + 1) * cout] += w_pt[:, :, kk].T
    return W, lout


def _convT_dense(w_pt, lin, stride, pad, out_pad):
    """ConvTranspose1d folded into a dense (Lin*Cin, Lout*Cout) operator."""
    cin, cout, k = w_pt.shape                       # PyTorch (Cin, Cout, K)
    lout = (lin - 1) * stride - 2 * pad + k + out_pad
    W = np.zeros((lin * cin, lout * cout), np.float32)
    for j in range(lin):
        for kk in range(k):
            i = j * stride + kk - pad
            if 0 <= i < lout:
                W[j * cin:(j + 1) * cin, i * cout:(i + 1) * cout] += w_pt[:, :, kk]
    return W, lout


def prepare_params(p, *, seq_len=SEQ_LEN):
    """One-time weight folding: per-layer dense operators + folded FC bottleneck."""
    pn = {k: np.asarray(v, np.float32) for k, v in p.items()}
    L, V, E = seq_len, VOCAB, EMB_DIM
    Lq, C4 = L // 4, 4 * HID

    # embedding / LayerNorm operators in the flat (B, L*C) layout
    bc = np.zeros((L, L * V), np.float32)                 # broadcast ids across vocab lanes
    tok = np.tile(np.arange(V, dtype=np.float32), L)[None, :]   # lane -> token id
    embop = np.zeros((L * V, L * E), np.float32)          # block-diag embedding matrix
    avg = np.zeros((L * E, L * E), np.float32)            # per-position block averaging
    for l in range(L):
        bc[l, l * V:(l + 1) * V] = 1.0
        embop[l * V:(l + 1) * V, l * E:(l + 1) * E] = pn["emb"]
        avg[l * E:(l + 1) * E, l * E:(l + 1) * E] = 1.0 / E
    lng = np.tile(pn["ln_g"], L)[None, :]
    lnb = np.tile(pn["ln_b"], L)[None, :]

    # dense per-layer conv operators (stride / pad / output_padding baked in)
    w1, l1 = _conv_dense(pn["c1_w"], L, 2, 3)
    w2, l2 = _conv_dense(pn["c2_w"], l1, 2, 3)
    w3, l3 = _conv_dense(pn["c3_w"], l2, 1, 3)
    w4, l4 = _convT_dense(pn["d1_w"], l3, 1, 3, 0)
    w5, l5 = _convT_dense(pn["d2_w"], l4, 2, 3, 1)
    w6, l6 = _convT_dense(pn["d3_w"], l5, 2, 3, 1)
    assert (l1, l2, l3, l4, l5, l6) == (L // 2, Lq, Lq, Lq, L // 2, L)

    b1 = np.tile(pn["c1_b"], l1)[None, :]
    b2 = np.tile(pn["c2_b"], l2)[None, :]
    b3 = np.tile(pn["c3_b"], l3)[None, :]
    b4 = np.tile(pn["d1_b"], l4)[None, :]
    b5 = np.tile(pn["d2_b"], l5)[None, :]
    b6 = np.tile(pn["d3_b"], l6)[None, :]

    # FC bottleneck: fold PyTorch's (B, C4, Lq).view(B,-1) flatten order into the
    # weights, then compose encoder_fc @ decoder_fc into one (Lq*C4, Lq*C4) matrix.
    we = pn["efc_w"].reshape(LATENT, C4, Lq).transpose(2, 1, 0).reshape(Lq * C4, LATENT)
    wd = pn["dfc_w"].reshape(C4, Lq, LATENT).transpose(2, 1, 0).reshape(LATENT, Lq * C4)
    bd = pn["dfc_b"].reshape(C4, Lq).T.reshape(Lq * C4)
    wbn = we @ wd
    bbn = (pn["efc_b"] @ wd + bd)[None, :]

    # output projection: block-diag (L*E, L*VPAD_OUT), lane-dense store
    wop = np.zeros((L * E, L * VPAD_OUT), np.float32)
    bop = np.zeros((1, L * VPAD_OUT), np.float32)
    for l in range(L):
        wop[l * E:(l + 1) * E, l * VPAD_OUT:l * VPAD_OUT + V] = pn["op_w"].T
        bop[0, l * VPAD_OUT:l * VPAD_OUT + V] = pn["op_b"]

    consts = (bc, tok, embop, avg, lng, lnb,
              w1, b1, w2, b2, w3, b3, wbn, bbn,
              w4, b4, w5, b5, w6, b6, wop, bop)
    return tuple(jnp.asarray(c) for c in consts)


# ------------------------------------------------------------------ forward --
def cae_forward(ids, consts):
    B, L = ids.shape
    ids3 = ids.astype(jnp.int32).reshape(B, 1, L)
    out = pl.pallas_call(
        _cae_fused_kernel,
        grid=(B,),
        in_specs=[pl.BlockSpec((1, 1, L), lambda b: (b, 0, 0))]
                 + [pl.BlockSpec(c.shape, lambda b: (0, 0)) for c in consts],
        out_specs=pl.BlockSpec((1, 1, L * VPAD_OUT), lambda b: (b, 0, 0)),
        out_shape=jax.ShapeDtypeStruct((B, 1, L * VPAD_OUT), jnp.float32),
        compiler_params=pltpu.CompilerParams(dimension_semantics=("parallel",)),
    )(ids3, *consts)
    return out.reshape(B, L, VPAD_OUT)[:, :, :VOCAB]
    # TODO(synk): loss_fn / blosum62_loss are not part of forward(); not implemented here.


# ----------------------------------------------------------------- params ----
def init_params(key):
    ks = jax.random.split(key, 16)

    def rnd(k, shape, scale=0.1):
        return scale * jax.random.normal(k, shape, jnp.float32)

    emb = rnd(ks[0], (VOCAB, EMB_DIM))
    emb = emb.at[PAD_IDX].set(0.0)                    # padding_idx row is zero
    return {
        "emb": emb,
        "ln_g": jnp.ones((EMB_DIM,), jnp.float32),
        "ln_b": jnp.zeros((EMB_DIM,), jnp.float32),
        # encoder convs: PyTorch layout (Cout, Cin, K)
        "c1_w": rnd(ks[1], (HID, EMB_DIM, K)),        "c1_b": rnd(ks[2], (HID,)),
        "c2_w": rnd(ks[3], (2 * HID, HID, K)),        "c2_b": rnd(ks[4], (2 * HID,)),
        "c3_w": rnd(ks[5], (4 * HID, 2 * HID, K)),    "c3_b": rnd(ks[6], (4 * HID,)),
        # linears: PyTorch layout (Dout, Din)
        "efc_w": rnd(ks[7], (LATENT, HID * SEQ_LEN)), "efc_b": jnp.zeros((LATENT,), jnp.float32),
        "dfc_w": rnd(ks[8], (HID * SEQ_LEN, LATENT)), "dfc_b": jnp.zeros((HID * SEQ_LEN,), jnp.float32),
        # decoder transposed convs: PyTorch layout (Cin, Cout, K)
        "d1_w": rnd(ks[9], (4 * HID, 2 * HID, K)),    "d1_b": rnd(ks[10], (2 * HID,)),
        "d2_w": rnd(ks[11], (2 * HID, HID, K)),       "d2_b": rnd(ks[12], (HID,)),
        "d3_w": rnd(ks[13], (HID, EMB_DIM, K)),       "d3_b": rnd(ks[14], (EMB_DIM,)),
        # output projection
        "op_w": rnd(ks[15], (VOCAB, EMB_DIM)),        "op_b": jnp.zeros((VOCAB,), jnp.float32),
    }


# -------------------------------------------------------------------- main ---
if __name__ == "__main__":
    key = jax.random.PRNGKey(0)
    k_params, k_ids = jax.random.split(key)
    params = init_params(k_params)
    consts = prepare_params(params)    # one-time weight folding / operator construction
    ids = jax.random.randint(k_ids, (BATCH, SEQ_LEN), 0, VOCAB, dtype=jnp.int32)

    fwd = jax.jit(cae_forward)
    logits = fwd(ids, consts)
    jax.block_until_ready(logits)

    assert logits.shape == (BATCH, SEQ_LEN, VOCAB), logits.shape
    assert logits.dtype == jnp.float32
    assert bool(jnp.all(jnp.isfinite(logits)))
    print("KERNEL_OK")
</pallas_src>

<mosaic_0001>
module attributes {stable_mosaic.version = 11 : i64} {
  func.func @_cae_fused_kernel(%arg0: i32, %arg1: memref<1x1x16xi32, #tpu.memory_space<vmem>>, %arg2: memref<16x400xf32, #tpu.memory_space<vmem>>, %arg3: memref<1x400xf32, #tpu.memory_space<vmem>>, %arg4: memref<400x80xf32, #tpu.memory_space<vmem>>, %arg5: memref<80x80xf32, #tpu.memory_space<vmem>>, %arg6: memref<1x80xf32, #tpu.memory_space<vmem>>, %arg7: memref<1x80xf32, #tpu.memory_space<vmem>>, %arg8: memref<80x64xf32, #tpu.memory_space<vmem>>, %arg9: memref<1x64xf32, #tpu.memory_space<vmem>>, %arg10: memref<64x64xf32, #tpu.memory_space<vmem>>, %arg11: memref<1x64xf32, #tpu.memory_space<vmem>>, %arg12: memref<64x128xf32, #tpu.memory_space<vmem>>, %arg13: memref<1x128xf32, #tpu.memory_space<vmem>>, %arg14: memref<128x128xf32, #tpu.memory_space<vmem>>, %arg15: memref<1x128xf32, #tpu.memory_space<vmem>>, %arg16: memref<128x64xf32, #tpu.memory_space<vmem>>, %arg17: memref<1x64xf32, #tpu.memory_space<vmem>>, %arg18: memref<64x64xf32, #tpu.memory_space<vmem>>, %arg19: memref<1x64xf32, #tpu.memory_space<vmem>>, %arg20: memref<64x80xf32, #tpu.memory_space<vmem>>, %arg21: memref<1x80xf32, #tpu.memory_space<vmem>>, %arg22: memref<80x512xf32, #tpu.memory_space<vmem>>, %arg23: memref<1x512xf32, #tpu.memory_space<vmem>>, %arg24: memref<1x1x512xf32, #tpu.memory_space<vmem>>) attributes {dimension_semantics = [#tpu.dimension_semantics<parallel>], iteration_bounds = array<i64: 2>, scalar_prefetch = 0 : i64, scratch_operands = 0 : i64, tpu.core_type = #tpu.core_type<tc>, window_params = [{transform_indices = @transform_0, window_bounds = array<i64: 1, 1, 16>}, {pipeline_mode = #tpu.pipeline_mode<synchronous>, transform_indices = @transform_1, window_bounds = array<i64: 16, 400>}, {pipeline_mode = #tpu.pipeline_mode<synchronous>, transform_indices = @transform_2, window_bounds = array<i64: 1, 400>}, {pipeline_mode = #tpu.pipeline_mode<synchronous>, transform_indices = @transform_3, window_bounds = array<i64: 400, 80>}, {pipeline_mode = #tpu.pipeline_mode<synchronous>, transform_indices = @transform_4, window_bounds = array<i64: 80, 80>}, {pipeline_mode = #tpu.pipeline_mode<synchronous>, transform_indices = @transform_5, window_bounds = array<i64: 1, 80>}, {pipeline_mode = #tpu.pipeline_mode<synchronous>, transform_indices = @transform_6, window_bounds = array<i64: 1, 80>}, {pipeline_mode = #tpu.pipeline_mode<synchronous>, transform_indices = @transform_7, window_bounds = array<i64: 80, 64>}, {pipeline_mode = #tpu.pipeline_mode<synchronous>, transform_indices = @transform_8, window_bounds = array<i64: 1, 64>}, {pipeline_mode = #tpu.pipeline_mode<synchronous>, transform_indices = @transform_9, window_bounds = array<i64: 64, 64>}, {pipeline_mode = #tpu.pipeline_mode<synchronous>, transform_indices = @transform_10, window_bounds = array<i64: 1, 64>}, {pipeline_mode = #tpu.pipeline_mode<synchronous>, transform_indices = @transform_11, window_bounds = array<i64: 64, 128>}, {pipeline_mode = #tpu.pipeline_mode<synchronous>, transform_indices = @transform_12, window_bounds = array<i64: 1, 128>}, {pipeline_mode = #tpu.pipeline_mode<synchronous>, transform_indices = @transform_13, window_bounds = array<i64: 128, 128>}, {pipeline_mode = #tpu.pipeline_mode<synchronous>, transform_indices = @transform_14, window_bounds = array<i64: 1, 128>}, {pipeline_mode = #tpu.pipeline_mode<synchronous>, transform_indices = @transform_15, window_bounds = array<i64: 128, 64>}, {pipeline_mode = #tpu.pipeline_mode<synchronous>, transform_indices = @transform_16, window_bounds = array<i64: 1, 64>}, {pipeline_mode = #tpu.pipeline_mode<synchronous>, transform_indices = @transform_17, window_bounds = array<i64: 64, 64>}, {pipeline_mode = #tpu.pipeline_mode<synchronous>, transform_indices = @transform_18, window_bounds = array<i64: 1, 64>}, {pipeline_mode = #tpu.pipeline_mode<synchronous>, transform_indices = @transform_19, window_bounds = array<i64: 64, 80>}, {pipeline_mode = #tpu.pipeline_mode<synchronous>, transform_indices = @transform_20, window_bounds = array<i64: 1, 80>}, {pipeline_mode = #tpu.pipeline_mode<synchronous>, transform_indices = @transform_21, window_bounds = array<i64: 80, 512>}, {pipeline_mode = #tpu.pipeline_mode<synchronous>, transform_indices = @transform_22, window_bounds = array<i64: 1, 512>}, {transform_indices = @transform_23, window_bounds = array<i64: 1, 1, 512>}]} {
    %c0 = arith.constant 0 : index
    %c0_0 = arith.constant 0 : index
    %c0_1 = arith.constant 0 : index
    %0 = vector.load %arg1[%c0, %c0_0, %c0_1] : memref<1x1x16xi32, #tpu.memory_space<vmem>>, vector<1x1x16xi32>
    %1 = vector.shape_cast %0 : vector<1x1x16xi32> to vector<1x16xi32>
    %2 = arith.sitofp %1 : vector<1x16xi32> to vector<1x16xf32>
    %c0_2 = arith.constant 0 : index
    %c0_3 = arith.constant 0 : index
    %3 = vector.load %arg2[%c0_2, %c0_3] : memref<16x400xf32, #tpu.memory_space<vmem>>, vector<16x400xf32>
    %cst = arith.constant dense<0.000000e+00> : vector<1x400xf32>
    %4 = tpu.matmul %2, %3, %cst {dimension_numbers = #tpu.dot_dimension_numbers<[1], [0], [0], [1], [0, 0, 1, 1], [], []>} : vector<1x16xf32>, vector<16x400xf32>, vector<1x400xf32> -> vector<1x400xf32>
    %c0_4 = arith.constant 0 : index
    %c0_5 = arith.constant 0 : index
    %5 = vector.load %arg3[%c0_4, %c0_5] : memref<1x400xf32, #tpu.memory_space<vmem>>, vector<1x400xf32>
    %6 = arith.subf %4, %5 : vector<1x400xf32>
    %7 = math.absf %6 : vector<1x400xf32>
    %cst_6 = arith.constant 5.000000e-01 : f32
    %8 = vector.broadcast %cst_6 : f32 to vector<1x400xf32>
    %9 = arith.cmpf olt, %7, %8 : vector<1x400xf32>
    %10 = arith.extui %9 : vector<1x400xi1> to vector<1x400xi32>
    %11 = arith.sitofp %10 : vector<1x400xi32> to vector<1x400xf32>
    %c0_7 = arith.constant 0 : index
    %c0_8 = arith.constant 0 : index
    %12 = vector.load %arg4[%c0_7, %c0_8] : memref<400x80xf32, #tpu.memory_space<vmem>>, vector<400x80xf32>
    %cst_9 = arith.constant dense<0.000000e+00> : vector<1x80xf32>
    %13 = tpu.matmul %11, %12, %cst_9 {dimension_numbers = #tpu.dot_dimension_numbers<[1], [0], [0], [1], [0, 0, 1, 1], [], []>} : vector<1x400xf32>, vector<400x80xf32>, vector<1x80xf32> -> vector<1x80xf32>
    %c0_10 = arith.constant 0 : index
    %c0_11 = arith.constant 0 : index
    %14 = vector.load %arg5[%c0_10, %c0_11] : memref<80x80xf32, #tpu.memory_space<vmem>>, vector<80x80xf32>
    %cst_12 = arith.constant dense<0.000000e+00> : vector<1x80xf32>
    %15 = tpu.matmul %13, %14, %cst_12 {dimension_numbers = #tpu.dot_dimension_numbers<[1], [0], [0], [1], [0, 0, 1, 1], [], []>} : vector<1x80xf32>, vector<80x80xf32>, vector<1x80xf32> -> vector<1x80xf32>
    %16 = arith.subf %13, %15 : vector<1x80xf32>
    %17 = arith.mulf %16, %16 : vector<1x80xf32>
    %c0_13 = arith.constant 0 : index
    %c0_14 = arith.constant 0 : index
    %18 = vector.load %arg5[%c0_13, %c0_14] : memref<80x80xf32, #tpu.memory_space<vmem>>, vector<80x80xf32>
    %cst_15 = arith.constant dense<0.000000e+00> : vector<1x80xf32>
    %19 = tpu.matmul %17, %18, %cst_15 {dimension_numbers = #tpu.dot_dimension_numbers<[1], [0], [0], [1], [0, 0, 1, 1], [], []>} : vector<1x80xf32>, vector<80x80xf32>, vector<1x80xf32> -> vector<1x80xf32>
    %cst_16 = arith.constant 9.99999974E-6 : f32
    %20 = vector.broadcast %cst_16 : f32 to vector<1x80xf32>
    %21 = arith.addf %19, %20 : vector<1x80xf32>
    %22 = math.rsqrt %21 : vector<1x80xf32>
    %23 = arith.mulf %16, %22 : vector<1x80xf32>
    %c0_17 = arith.constant 0 : index
    %c0_18 = arith.constant 0 : index
    %24 = vector.load %arg6[%c0_17, %c0_18] : memref<1x80xf32, #tpu.memory_space<vmem>>, vector<1x80xf32>
    %25 = arith.mulf %23, %24 : vector<1x80xf32>
    %c0_19 = arith.constant 0 : index
    %c0_20 = arith.constant 0 : index
    %26 = vector.load %arg7[%c0_19, %c0_20] : memref<1x80xf32, #tpu.memory_space<vmem>>, vector<1x80xf32>
    %27 = arith.addf %25, %26 : vector<1x80xf32>
    %c0_21 = arith.constant 0 : index
    %c0_22 = arith.constant 0 : index
    %28 = vector.load %arg8[%c0_21, %c0_22] : memref<80x64xf32, #tpu.memory_space<vmem>>, vector<80x64xf32>
    %cst_23 = arith.constant dense<0.000000e+00> : vector<1x64xf32>
    %29 = tpu.matmul %27, %28, %cst_23 {dimension_numbers = #tpu.dot_dimension_numbers<[1], [0], [0], [1], [0, 0, 1, 1], [], []>} : vector<1x80xf32>, vector<80x64xf32>, vector<1x64xf32> -> vector<1x64xf32>
    %c0_24 = arith.constant 0 : index
    %c0_25 = arith.constant 0 : index
    %30 = vector.load %arg9[%c0_24, %c0_25] : memref<1x64xf32, #tpu.memory_space<vmem>>, vector<1x64xf32>
    %31 = arith.addf %29, %30 : vector<1x64xf32>
    %cst_26 = arith.constant 0.000000e+00 : f32
    %32 = vector.broadcast %cst_26 : f32 to vector<1x64xf32>
    %33 = arith.maximumf %31, %32 : vector<1x64xf32>
    %c0_27 = arith.constant 0 : index
    %c0_28 = arith.constant 0 : index
    %34 = vector.load %arg10[%c0_27, %c0_28] : memref<64x64xf32, #tpu.memory_space<vmem>>, vector<64x64xf32>
    %cst_29 = arith.constant dense<0.000000e+00> : vector<1x64xf32>
    %35 = tpu.matmul %33, %34, %cst_29 {dimension_numbers = #tpu.dot_dimension_numbers<[1], [0], [0], [1], [0, 0, 1, 1], [], []>} : vector<1x64xf32>, vector<64x64xf32>, vector<1x64xf32> -> vector<1x64xf32>
    %c0_30 = arith.constant 0 : index
    %c0_31 = arith.constant 0 : index
    %36 = vector.load %arg11[%c0_30, %c0_31] : memref<1x64xf32, #tpu.memory_space<vmem>>, vector<1x64xf32>
    %37 = arith.addf %35, %36 : vector<1x64xf32>
    %cst_32 = arith.constant 0.000000e+00 : f32
    %38 = vector.broadcast %cst_32 : f32 to vector<1x64xf32>
    %39 = arith.maximumf %37, %38 : vector<1x64xf32>
    %c0_33 = arith.constant 0 : index
    %c0_34 = arith.constant 0 : index
    %40 = vector.load %arg12[%c0_33, %c0_34] : memref<64x128xf32, #tpu.memory_space<vmem>>, vector<64x128xf32>
    %cst_35 = arith.constant dense<0.000000e+00> : vector<1x128xf32>
    %41 = tpu.matmul %39, %40, %cst_35 {dimension_numbers = #tpu.dot_dimension_numbers<[1], [0], [0], [1], [0, 0, 1, 1], [], []>} : vector<1x64xf32>, vector<64x128xf32>, vector<1x128xf32> -> vector<1x128xf32>
    %c0_36 = arith.constant 0 : index
    %c0_37 = arith.constant 0 : index
    %42 = vector.load %arg13[%c0_36, %c0_37] : memref<1x128xf32, #tpu.memory_space<vmem>>, vector<1x128xf32>
    %43 = arith.addf %41, %42 : vector<1x128xf32>
    %cst_38 = arith.constant 0.000000e+00 : f32
    %44 = vector.broadcast %cst_38 : f32 to vector<1x128xf32>
    %45 = arith.maximumf %43, %44 : vector<1x128xf32>
    %c0_39 = arith.constant 0 : index
    %c0_40 = arith.constant 0 : index
    %46 = vector.load %arg14[%c0_39, %c0_40] : memref<128x128xf32, #tpu.memory_space<vmem>>, vector<128x128xf32>
    %cst_41 = arith.constant dense<0.000000e+00> : vector<1x128xf32>
    %47 = tpu.matmul %45, %46, %cst_41 {dimension_numbers = #tpu.dot_dimension_numbers<[1], [0], [0], [1], [0, 0, 1, 1], [], []>} : vector<1x128xf32>, vector<128x128xf32>, vector<1x128xf32> -> vector<1x128xf32>
    %c0_42 = arith.constant 0 : index
    %c0_43 = arith.constant 0 : index
    %48 = vector.load %arg15[%c0_42, %c0_43] : memref<1x128xf32, #tpu.memory_space<vmem>>, vector<1x128xf32>
    %49 = arith.addf %47, %48 : vector<1x128xf32>
    %c0_44 = arith.constant 0 : index
    %c0_45 = arith.constant 0 : index
    %50 = vector.load %arg16[%c0_44, %c0_45] : memref<128x64xf32, #tpu.memory_space<vmem>>, vector<128x64xf32>
    %cst_46 = arith.constant dense<0.000000e+00> : vector<1x64xf32>
    %51 = tpu.matmul %49, %50, %cst_46 {dimension_numbers = #tpu.dot_dimension_numbers<[1], [0], [0], [1], [0, 0, 1, 1], [], []>} : vector<1x128xf32>, vector<128x64xf32>, vector<1x64xf32> -> vector<1x64xf32>
    %c0_47 = arith.constant 0 : index
    %c0_48 = arith.constant 0 : index
    %52 = vector.load %arg17[%c0_47, %c0_48] : memref<1x64xf32, #tpu.memory_space<vmem>>, vector<1x64xf32>
    %53 = arith.addf %51, %52 : vector<1x64xf32>
    %cst_49 = arith.constant 0.000000e+00 : f32
    %54 = vector.broadcast %cst_49 : f32 to vector<1x64xf32>
    %55 = arith.maximumf %53, %54 : vector<1x64xf32>
    %c0_50 = arith.constant 0 : index
    %c0_51 = arith.constant 0 : index
    %56 = vector.load %arg18[%c0_50, %c0_51] : memref<64x64xf32, #tpu.memory_space<vmem>>, vector<64x64xf32>
    %cst_52 = arith.constant dense<0.000000e+00> : vector<1x64xf32>
    %57 = tpu.matmul %55, %56, %cst_52 {dimension_numbers = #tpu.dot_dimension_numbers<[1], [0], [0], [1], [0, 0, 1, 1], [], []>} : vector<1x64xf32>, vector<64x64xf32>, vector<1x64xf32> -> vector<1x64xf32>
    %c0_53 = arith.constant 0 : index
    %c0_54 = arith.constant 0 : index
    %58 = vector.load %arg19[%c0_53, %c0_54] : memref<1x64xf32, #tpu.memory_space<vmem>>, vector<1x64xf32>
    %59 = arith.addf %57, %58 : vector<1x64xf32>
    %cst_55 = arith.constant 0.000000e+00 : f32
    %60 = vector.broadcast %cst_55 : f32 to vector<1x64xf32>
    %61 = arith.maximumf %59, %60 : vector<1x64xf32>
    %c0_56 = arith.constant 0 : index
    %c0_57 = arith.constant 0 : index
    %62 = vector.load %arg20[%c0_56, %c0_57] : memref<64x80xf32, #tpu.memory_space<vmem>>, vector<64x80xf32>
    %cst_58 = arith.constant dense<0.000000e+00> : vector<1x80xf32>
    %63 = tpu.matmul %61, %62, %cst_58 {dimension_numbers = #tpu.dot_dimension_numbers<[1], [0], [0], [1], [0, 0, 1, 1], [], []>} : vector<1x64xf32>, vector<64x80xf32>, vector<1x80xf32> -> vector<1x80xf32>
    %c0_59 = arith.constant 0 : index
    %c0_60 = arith.constant 0 : index
    %64 = vector.load %arg21[%c0_59, %c0_60] : memref<1x80xf32, #tpu.memory_space<vmem>>, vector<1x80xf32>
    %65 = arith.addf %63, %64 : vector<1x80xf32>
    %cst_61 = arith.constant 0.000000e+00 : f32
    %66 = vector.broadcast %cst_61 : f32 to vector<1x80xf32>
    %67 = arith.maximumf %65, %66 : vector<1x80xf32>
    %c0_62 = arith.constant 0 : index
    %c0_63 = arith.constant 0 : index
    %68 = vector.load %arg22[%c0_62, %c0_63] : memref<80x512xf32, #tpu.memory_space<vmem>>, vector<80x512xf32>
    %cst_64 = arith.constant dense<0.000000e+00> : vector<1x512xf32>
    %69 = tpu.matmul %67, %68, %cst_64 {dimension_numbers = #tpu.dot_dimension_numbers<[1], [0], [0], [1], [0, 0, 1, 1], [], []>} : vector<1x80xf32>, vector<80x512xf32>, vector<1x512xf32> -> vector<1x512xf32>
    %c0_65 = arith.constant 0 : index
    %c0_66 = arith.constant 0 : index
    %70 = vector.load %arg23[%c0_65, %c0_66] : memref<1x512xf32, #tpu.memory_space<vmem>>, vector<1x512xf32>
    %71 = arith.addf %69, %70 : vector<1x512xf32>
    %c0_67 = arith.constant 0 : index
    %c0_68 = arith.constant 0 : index
    %c0_69 = arith.constant 0 : index
    %72 = vector.load %arg24[%c0_67, %c0_68, %c0_69] : memref<1x1x512xf32, #tpu.memory_space<vmem>>, vector<1x1x512xf32>
    %73 = vector.shape_cast %72 : vector<1x1x512xf32> to vector<1x512xf32>
    %74 = vector.shape_cast %71 : vector<1x512xf32> to vector<1x1x512xf32>
    tpu.vector_store %arg24[%c0_67, %c0_68, %c0_69], %74 {strides = array<i32>} : memref<1x1x512xf32, #tpu.memory_space<vmem>>, vector<1x1x512xf32>,
    return
  }
  func.func @transform_0(%arg0: i32) -> (i32, i32, i32) {
    %c0_i32 = arith.constant 0 : i32
    %c0_i32_0 = arith.constant 0 : i32
    %c0_i32_1 = arith.constant 0 : i32
    return %arg0, %c0_i32, %c0_i32_0 : i32, i32, i32
  }
  func.func @transform_1(%arg0: i32) -> (i32, i32) {
    %c0_i32 = arith.constant 0 : i32
    %c0_i32_0 = arith.constant 0 : i32
    %c0_i32_1 = arith.constant 0 : i32
    return %c0_i32, %c0_i32_0 : i32, i32
  }
  func.func @transform_2(%arg0: i32) -> (i32, i32) {
    %c0_i32 = arith.constant 0 : i32
    %c0_i32_0 = arith.constant 0 : i32
    %c0_i32_1 = arith.constant 0 : i32
    return %c0_i32, %c0_i32_0 : i32, i32
  }
  func.func @transform_3(%arg0: i32) -> (i32, i32) {
    %c0_i32 = arith.constant 0 : i32
    %c0_i32_0 = arith.constant 0 : i32
    %c0_i32_1 = arith.constant 0 : i32
    return %c0_i32, %c0_i32_0 : i32, i32
  }
  func.func @transform_4(%arg0: i32) -> (i32, i32) {
    %c0_i32 = arith.constant 0 : i32
    %c0_i32_0 = arith.constant 0 : i32
    %c0_i32_1 = arith.constant 0 : i32
    return %c0_i32, %c0_i32_0 : i32, i32
  }
  func.func @transform_5(%arg0: i32) -> (i32, i32) {
    %c0_i32 = arith.constant 0 : i32
    %c0_i32_0 = arith.constant 0 : i32
    %c0_i32_1 = arith.constant 0 : i32
    return %c0_i32, %c0_i32_0 : i32, i32
  }
  func.func @transform_6(%arg0: i32) -> (i32, i32) {
    %c0_i32 = arith.constant 0 : i32
    %c0_i32_0 = arith.constant 0 : i32
    %c0_i32_1 = arith.constant 0 : i32
    return %c0_i32, %c0_i32_0 : i32, i32
  }
  func.func @transform_7(%arg0: i32) -> (i32, i32) {
    %c0_i32 = arith.constant 0 : i32
    %c0_i32_0 = arith.constant 0 : i32
    %c0_i32_1 = arith.constant 0 : i32
    return %c0_i32, %c0_i32_0 : i32, i32
  }
  func.func @transform_8(%arg0: i32) -> (i32, i32) {
    %c0_i32 = arith.constant 0 : i32
    %c0_i32_0 = arith.constant 0 : i32
    %c0_i32_1 = arith.constant 0 : i32
    return %c0_i32, %c0_i32_0 : i32, i32
  }
  func.func @transform_9(%arg0: i32) -> (i32, i32) {
    %c0_i32 = arith.constant 0 : i32
    %c0_i32_0 = arith.constant 0 : i32
    %c0_i32_1 = arith.constant 0 : i32
    return %c0_i32, %c0_i32_0 : i32, i32
  }
  func.func @transform_10(%arg0: i32) -> (i32, i32) {
    %c0_i32 = arith.constant 0 : i32
    %c0_i32_0 = arith.constant 0 : i32
    %c0_i32_1 = arith.constant 0 : i32
    return %c0_i32, %c0_i32_0 : i32, i32
  }
  func.func @transform_11(%arg0: i32) -> (i32, i32) {
    %c0_i32 = arith.constant 0 : i32
    %c0_i32_0 = arith.constant 0 : i32
    %c0_i32_1 = arith.constant 0 : i32
    return %c0_i32, %c0_i32_0 : i32, i32
  }
  func.func @transform_12(%arg0: i32) -> (i32, i32) {
    %c0_i32 = arith.constant 0 : i32
    %c0_i32_0 = arith.constant 0 : i32
    %c0_i32_1 = arith.constant 0 : i32
    return %c0_i32, %c0_i32_0 : i32, i32
  }
  func.func @transform_13(%arg0: i32) -> (i32, i32) {
    %c0_i32 = arith.constant 0 : i32
    %c0_i32_0 = arith.constant 0 : i32
    %c0_i32_1 = arith.constant 0 : i32
    return %c0_i32, %c0_i32_0 : i32, i32
  }
  func.func @transform_14(%arg0: i32) -> (i32, i32) {
    %c0_i32 = arith.constant 0 : i32
    %c0_i32_0 = arith.constant 0 : i32
    %c0_i32_1 = arith.constant 0 : i32
    return %c0_i32, %c0_i32_0 : i32, i32
  }
  func.func @transform_15(%arg0: i32) -> (i32, i32) {
    %c0_i32 = arith.constant 0 : i32
    %c0_i32_0 = arith.constant 0 : i32
    %c0_i32_1 = arith.constant 0 : i32
    return %c0_i32, %c0_i32_0 : i32, i32
  }
  func.func @transform_16(%arg0: i32) -> (i32, i32) {
    %c0_i32 = arith.constant 0 : i32
    %c0_i32_0 = arith.constant 0 : i32
    %c0_i32_1 = arith.constant 0 : i32
    return %c0_i32, %c0_i32_0 : i32, i32
  }
  func.func @transform_17(%arg0: i32) -> (i32, i32) {
    %c0_i32 = arith.constant 0 : i32
    %c0_i32_0 = arith.constant 0 : i32
    %c0_i32_1 = arith.constant 0 : i32
    return %c0_i32, %c0_i32_0 : i32, i32
  }
  func.func @transform_18(%arg0: i32) -> (i32, i32) {
    %c0_i32 = arith.constant 0 : i32
    %c0_i32_0 = arith.constant 0 : i32
    %c0_i32_1 = arith.constant 0 : i32
    return %c0_i32, %c0_i32_0 : i32, i32
  }
  func.func @transform_19(%arg0: i32) -> (i32, i32) {
    %c0_i32 = arith.constant 0 : i32
    %c0_i32_0 = arith.constant 0 : i32
    %c0_i32_1 = arith.constant 0 : i32
    return %c0_i32, %c0_i32_0 : i32, i32
  }
  func.func @transform_20(%arg0: i32) -> (i32, i32) {
    %c0_i32 = arith.constant 0 : i32
    %c0_i32_0 = arith.constant 0 : i32
    %c0_i32_1 = arith.constant 0 : i32
    return %c0_i32, %c0_i32_0 : i32, i32
  }
  func.func @transform_21(%arg0: i32) -> (i32, i32) {
    %c0_i32 = arith.constant 0 : i32
    %c0_i32_0 = arith.constant 0 : i32
    %c0_i32_1 = arith.constant 0 : i32
    return %c0_i32, %c0_i32_0 : i32, i32
  }
  func.func @transform_22(%arg0: i32) -> (i32, i32) {
    %c0_i32 = arith.constant 0 : i32
    %c0_i32_0 = arith.constant 0 : i32
    %c0_i32_1 = arith.constant 0 : i32
    return %c0_i32, %c0_i32_0 : i32, i32
  }
  func.func @transform_23(%arg0: i32) -> (i32, i32, i32) {
    %c0_i32 = arith.constant 0 : i32
    %c0_i32_0 = arith.constant 0 : i32
    %c0_i32_1 = arith.constant 0 : i32
    return %arg0, %c0_i32, %c0_i32_0 : i32, i32, i32
  }
}

</mosaic_0001>

<bundles_post_ra>
// kernel: cae_forward.1
= control target key start
LH: loop header
LB: loop body
LE: loop exit
PB: predicated region body
PF: predicated region fallthrough
CT: control target
= control target key end

     0   :  { %s2394_s0 = inlined_call_operand.vmem [shape: s32[2,1,16], index: 0, kind: input, shape index: {}]   ;;  %s2395_s1 = inlined_call_operand.vmem [shape: f32[16,400], index: 1, kind: input, shape index: {}]   ;;  %s2396_s2 = inlined_call_operand.vmem [shape: f32[1,400], index: 2, kind: input, shape index: {}]   ;;  %s2397_s3 = inlined_call_operand.vmem [shape: f32[400,80], index: 3, kind: input, shape index: {}]   ;;  %s2398_s4 = inlined_call_operand.vmem [shape: f32[80,80], index: 4, kind: input, shape index: {}]   ;;  %s2399_s5 = inlined_call_operand.vmem [shape: f32[1,80], index: 5, kind: input, shape index: {}]   ;;  %s2400_s6 = inlined_call_operand.vmem [shape: f32[1,80], index: 6, kind: input, shape index: {}]   ;;  %s2401_s7 = inlined_call_operand.vmem [shape: f32[80,64], index: 7, kind: input, shape index: {}]   ;;  %s2402_s8 = inlined_call_operand.vmem [shape: f32[1,64], index: 8, kind: input, shape index: {}]   ;;  %s2403_s9 = inlined_call_operand.vmem [shape: f32[64,64], index: 9, kind: input, shape index: {}]   ;;  %s2404_s10 = inlined_call_operand.vmem [shape: f32[1,64], index: 10, kind: input, shape index: {}]   ;;  %s2405_s11 = inlined_call_operand.vmem [shape: f32[64,128], index: 11, kind: input, shape index: {}]   ;;  %s2406_s12 = inlined_call_operand.vmem [shape: f32[1,128], index: 12, kind: input, shape index: {}]   ;;  %s2407_s13 = inlined_call_operand.vmem [shape: f32[128,128], index: 13, kind: input, shape index: {}]   ;;  %s2408_s14 = inlined_call_operand.vmem [shape: f32[1,128], index: 14, kind: input, shape index: {}]   ;;  %s2409_s15 = inlined_call_operand.vmem [shape: f32[128,64], index: 15, kind: input, shape index: {}]   ;;  %s2410_s16 = inlined_call_operand.vmem [shape: f32[1,64], index: 16, kind: input, shape index: {}]   ;;  %s2411_s17 = inlined_call_operand.hbm [shape: f32[64,64], index: 17, kind: input, shape index: {}]   ;;  %s2412_s18 = inlined_call_operand.vmem [shape: f32[1,64], index: 18, kind: input, shape index: {}]   ;;  %s2413_s19 = inlined_call_operand.hbm [shape: f32[64,80], index: 19, kind: input, shape index: {}]   ;;  %s2414_s20 = inlined_call_operand.vmem [shape: f32[1,80], index: 20, kind: input, shape index: {}]   ;;  %s2415_s21 = inlined_call_operand.vmem [shape: f32[80,512], index: 21, kind: input, shape index: {}]   ;;  %s2416_s22 = inlined_call_operand.vmem [shape: f32[1,512], index: 22, kind: input, shape index: {}]   ;;  %s2417_s23 = inlined_call_operand.vmem [shape: f32[2,1,512], index: 23, kind: output, shape index: {}]  }
   0x1   :  { %2423 = sst [smem:[#allocation8_spill]] %s2394_s0 }
   0x2   :  { %2424 = sst [smem:[#allocation9_spill]] %s2395_s1 }
   0x3   :  { %2425 = sst [smem:[#allocation10_spill]] %s2396_s2 }
   0x4   :  { %2426 = sst [smem:[#allocation11_spill]] %s2397_s3 }
   0x5   :  { %2427 = sst [smem:[#allocation12_spill]] %s2398_s4 }
   0x6   :  { %2428 = sst [smem:[#allocation13_spill]] %s2399_s5 }
   0x7   :  { %2429 = sst [smem:[#allocation14_spill]] %s2400_s6 }
   0x8   :  { %2430 = sst [smem:[#allocation15_spill]] %s2401_s7 }
   0x9   :  { %28 = vsyncpa [#allocation3], 0 }
   0xa   :  { %29 = vsyncpa [#allocation5], 0  ;;  %s1807_s4 = smov 0  }
   0xb LB: > { %s613_s25 = sshll.u32 %s2411_s17, 4  ;;  %s1535_s5 = sadd.s32 4294967295, %s1679_s4   ;;  %s1679_s4 = sphi %s1807_s4, %s35_s4   ;;  %s614_s25 = int_to_ptr.hbm [resolvable:$true] %s613_s25 }
   0xc   : > { %p1537_p0 = scmp.ge.s32.totalorder %s1679_s4, 1  ;;  %p554_p1 = scmp.lt.s32.totalorder %s1679_s4, 3 }
   0xd   : > { %p1585_p2 = scmp.eq.s32.totalorder %s1535_s5, 0  ;;  %s1681_s26 = smov [#allocation2]  }
   0xe   : > { %p1818_p3 = pnand %p1537_p0, %p554_p1  ;;  %s615_s2 = sshll.u32 %s1681_s26, 4  ;;  %s616_s2 = int_to_ptr.vmem [resolvable:$true] %s615_s2 }
   0xf   : > { %s630_s7 = sshll.u32 %s2413_s19, 4  ;;  %s1682_s28 = smov [#allocation4]   ;;  %s631_s7 = int_to_ptr.hbm [resolvable:$true] %s630_s7 }
  0x10   : > { %p1578_p4 = pneg %p1818_p3  ;;  %s632_s29 = sshll.u32 %s1682_s28, 4  ;;  %s633_s29 = int_to_ptr.vmem [resolvable:$true] %s632_s29 }
  0x11   : > { %s1683_s3 = smov 128   ;;  %s1684_s0 = smov 8  }
  0x12   : > { %p1579_p5 = pnand %p1585_p2, %p1578_p4  ;;  %663 = sbr.rel (%p1818_p3) target bundleno = 1678 (0x68e), region = 112 }
  0x14   : > { %1581 = dma.hbm_to_vmem [thread:$0]  (!%p1579_p5), %s614_s25, 1024, %s616_s2, [#allocation3], %s1683_s3, %s1683_s3, %s1684_s0  }
  0x15   : > { %1584 = dma.hbm_to_vmem [thread:$0]  (!%p1579_p5), %s631_s7, 1024, %s633_s29, [#allocation5], %s1683_s3, %s1683_s3, %s1684_s0  }
  0x17   : > { %1670 = dma.done.wait (%p1585_p2), [#allocation3], 1024  }
  0x18   : > { %1672 = vsyncadd (%p1585_p2), [#allocation3], 4294966272 }
  0x19   : > { %1674 = dma.done.wait (%p1585_p2), [#allocation5], 1024  }
  0x1a   : > { %1676 = vsyncadd (%p1585_p2), [#allocation5], 4294966272  ;;  %p730_p6 = scmp.lt.s32.totalorder %s1535_s5, 1  ;;  %s2432_s26 = sld [smem:[#allocation8_spill]]  ;;  %vm747_vm0 = vcmask 130048   ;;  %vm1004_vm5 = vcmask 654336  }
  0x1b   : > { %s2433_s1 = sld [smem:[#allocation9_spill]]  ;;  %vm1112_vm9 = vcmask 523264   ;;  %vm1451_vm10 = vcmask 1040384   ;;  %vm1453_vm11 = vcmask 1042434   ;;  %vm1455_vm12 = vcmask 1041408  }
  0x1c   : > { %s2441_s5 = smov (!%p730_p6, %s1535_s5), 1  ;;  %s2434_s7 = sld [smem:[#allocation11_spill]] }
  0x1d   : > { %s2435_s30 = sld [smem:[#allocation10_spill]] }
  0x1e   : > { %s2436_s2 = sld [smem:[#allocation12_spill]] }
  0x1f   : > { %s2437_s6 = sld [smem:[#allocation15_spill]] }
  0x20   : > { %s732_s25 = scalar_lea.vmem %s2432_s26, %s2441_s5  ;;  %s2438_s27 = sld [smem:[#allocation13_spill]] }
  0x21   : > { %v743_v0 = vld [vmem:[%s2433_s1 + $0x20] sm:$0xff]  ;;  %v744_v1 = vld [vmem:[%s2433_s1 + $0x28] sm:$0xff]  ;;  %v746_v6 = vld [vmem:[%s2433_s1 + $0x38] sm:$0xff]  ;;  %s2439_s29 = sld [smem:[#allocation14_spill]] }
  0x22   : > { %v739_v2 = vld [vmem:[%s2433_s1] sm:$0xff]  ;;  %765 = vmatpush.msra.mxu0 %v743_v0  ;;  %785 = vmatpush.msra.mxu3 %v744_v1  ;;  %v740_v3 = vld [vmem:[%s2433_s1 + $0x8] sm:$0xff]  ;;  %v745_v7 = vld [vmem:[%s2433_s1 + $0x30] sm:$0xff] }
  0x23   : > { %v737_v4 = vld [vmem:[%s732_s25] sm:$0x1]  ;;  %v892_v8 = vld [vmem:[%s2434_s7 + $0xf8] sm:$0xff]  ;;  %v741_v10 = vld [vmem:[%s2433_s1 + $0x10] sm:$0xff] }
  0x24   : > { %v738_v5 = vcvt.s32.f32 %v737_v4  ;;  %766 = vmatpush.msra.mxu0 %v739_v2  ;;  %786 = vmatpush.msra.mxu3 %v740_v3  ;;  %v742_v9 = vld [vmem:[%s2433_s1 + $0x18] sm:$0xff]  ;;  %v891_v13 = vld [vmem:[%s2434_s7 + $0xf0] sm:$0xff]  ;;  %v890_v16 = vld [vmem:[%s2434_s7 + $0xe8] sm:$0xff]  ;;  %v1685_v4 = vmov 1.0   ;;  %s1544_s1 = sshll.u32 %s2441_s5, 2 }
  0x25   : > { %v908_v11 = vld [vmem:[%s2434_s7 + $0x178] sm:$0xff]  ;;  %934 = vmatpush.msra.mxu1 %v892_v8  ;;  %v907_v14 = vld [vmem:[%s2434_s7 + $0x170] sm:$0xff]  ;;  %v906_v17 = vld [vmem:[%s2434_s7 + $0x168] sm:$0xff]  ;;  %s736_s26 = scalar_lea.vmem %s2417_s23, %s1544_s1 }
  0x26   : > { %1545 = vmatmul.msk.f32.vlgmr.msra.gmra.mxu0 %vm747_vm0, %v738_v5  ;;  %1546 = vmatmul.msk.f32.vlgmr.msra.gmra.mxu3 %vm747_vm0, %v738_v5  ;;  %v876_v12 = vld [vmem:[%s2434_s7 + $0x78] sm:$0xff]  ;;  %v875_v15 = vld [vmem:[%s2434_s7 + $0x70] sm:$0xff]  ;;  %v874_v18 = vld [vmem:[%s2434_s7 + $0x68] sm:$0xff] }
  0x27   : > { %825 = vmatpush.msrb.mxu3 %v746_v6  ;;  %805 = vmatpush.msrb.mxu0 %v745_v7  ;;  %v889_v19 = vld [vmem:[%s2434_s7 + $0xe0] sm:$0xff]  ;;  %v888_v22 = vld [vmem:[%s2434_s7 + $0xd8] sm:$0xff]  ;;  %v887_v25 = vld [vmem:[%s2434_s7 + $0xd0] sm:$0xff] }
  0x28   : > { %954 = vmatpush.msra.mxu2 %v908_v11  ;;  %935 = vmatpush.msra.mxu1 %v891_v13  ;;  %v905_v20 = vld [vmem:[%s2434_s7 + $0x160] sm:$0xff]  ;;  %v904_v23 = vld [vmem:[%s2434_s7 + $0x158] sm:$0xff]  ;;  %v903_v26 = vld [vmem:[%s2434_s7 + $0x150] sm:$0xff] }
  0x29   : > { %826 = vmatpush.msrb.mxu3 %v742_v9  ;;  %806 = vmatpush.msrb.mxu0 %v741_v10  ;;  %v873_v21 = vld [vmem:[%s2434_s7 + $0x60] sm:$0xff]  ;;  %v872_v24 = vld [vmem:[%s2434_s7 + $0x58] sm:$0xff]  ;;  %v871_v27 = vld [vmem:[%s2434_s7 + $0x50] sm:$0xff] }
  0x2a   : > { %955 = vmatpush.msra.mxu2 %v907_v14  ;;  %936 = vmatpush.msra.mxu1 %v890_v16  ;;  %v886_v28 = vld [vmem:[%s2434_s7 + $0xc8] sm:$0xff]  ;;  %v885_v31 = vld [vmem:[%s2434_s7 + $0xc0] sm:$0xff]  ;;  %v884_v34 = vld [vmem:[%s2434_s7 + $0xb8] sm:$0xff]  ;;  %v1686_v14 = vmov 0.0  }
  0x2b   : > { %914 = vmatpush.msra.mxu0 %v876_v12  ;;  %v902_v29 = vld [vmem:[%s2434_s7 + $0x148] sm:$0xff]  ;;  %v901_v32 = vld [vmem:[%s2434_s7 + $0x140] sm:$0xff]  ;;  %v900_v35 = vld [vmem:[%s2434_s7 + $0x138] sm:$0xff] }
  0x2c   : > { %956 = vmatpush.msra.mxu2 %v906_v17  ;;  %937 = vmatpush.msra.mxu1 %v889_v19  ;;  %v870_v30 = vld [vmem:[%s2434_s7 + $0x48] sm:$0xff]  ;;  %v869_v33 = vld [vmem:[%s2434_s7 + $0x40] sm:$0xff]  ;;  %v868_v36 = vld [vmem:[%s2434_s7 + $0x38] sm:$0xff] }
  0x2d   : > { %915 = vmatpush.msra.mxu0 %v875_v15  ;;  %v883_v37 = vld [vmem:[%s2434_s7 + $0xb0] sm:$0xff]  ;;  %v866_v39 = vld [vmem:[%s2434_s7 + $0x28] sm:$0xff]  ;;  %v865_v42 = vld [vmem:[%s2434_s7 + $0x20] sm:$0xff] }
  0x2e   : > { %1547 = vmatmul.msk.f32.vlgmr.msrb.gmra.mxu0 %vm747_vm0, %v738_v5  ;;  %1548 = vmatmul.msk.f32.vlgmr.msrb.gmra.mxu3 %vm747_vm0, %v738_v5  ;;  %v867_v38 = vld [vmem:[%s2434_s7 + $0x30] sm:$0xff]  ;;  %v882_v40 = vld [vmem:[%s2434_s7 + $0xa8] sm:$0xff]  ;;  %v881_v43 = vld [vmem:[%s2434_s7 + $0xa0] sm:$0xff] }
  0x2f   : > { %916 = vmatpush.msra.mxu0 %v874_v18  ;;  %957 = vmatpush.msra.mxu2 %v905_v20  ;;  %v899_v41 = vld [vmem:[%s2434_s7 + $0x130] sm:$0xff]  ;;  %v898_v44 = vld [vmem:[%s2434_s7 + $0x128] sm:$0xff]  ;;  %v864_v45 = vld [vmem:[%s2434_s7 + $0x18] sm:$0xff] }
  0x30   : > { %938 = vmatpush.msra.mxu1 %v888_v22  ;;  %v880_v46 = vld [vmem:[%s2434_s7 + $0x98] sm:$0xff]  ;;  %v897_v47 = vld [vmem:[%s2434_s7 + $0x120] sm:$0xff]  ;;  %v863_v48 = vld [vmem:[%s2434_s7 + $0x10] sm:$0xff] }
  0x31   : > { %917 = vmatpush.msra.mxu0 %v873_v21  ;;  %958 = vmatpush.msra.mxu2 %v904_v23  ;;  %v879_v49 = vld [vmem:[%s2434_s7 + $0x90] sm:$0xff]  ;;  %v896_v50 = vld [vmem:[%s2434_s7 + $0x118] sm:$0xff]  ;;  %v862_v51 = vld [vmem:[%s2434_s7 + $0x8] sm:$0xff] }
  0x32   : > { %939 = vmatpush.msra.mxu1 %v887_v25  ;;  %v878_v52 = vld [vmem:[%s2434_s7 + $0x88] sm:$0xff]  ;;  %v895_v53 = vld [vmem:[%s2434_s7 + $0x110] sm:$0xff]  ;;  %v861_v54 = vld [vmem:[%s2434_s7] sm:$0xff] }
  0x33   : > { %918 = vmatpush.msra.mxu0 %v872_v24  ;;  %959 = vmatpush.msra.mxu2 %v903_v26  ;;  %v877_v55 = vld [vmem:[%s2434_s7 + $0x80] sm:$0xff]  ;;  %v894_v56 = vld [vmem:[%s2434_s7 + $0x108] sm:$0xff]  ;;  %v1001_v18 = vld [vmem:[%s2436_s2 + $0x38] sm:$0xff] }
  0x34   : > { %940 = vmatpush.msra.mxu1 %v886_v28  ;;  %v893_v57 = vld [vmem:[%s2434_s7 + $0x100] sm:$0xff]  ;;  %v910_v58 = vld [vmem:[%s2434_s7 + $0x188] sm:$0xff]  ;;  %v1000_v19 = vld [vmem:[%s2436_s2 + $0x30] sm:$0xff] }
  0x35   : > { %919 = vmatpush.msra.mxu0 %v871_v27  ;;  %960 = vmatpush.msra.mxu2 %v902_v29  ;;  %v909_v59 = vld [vmem:[%s2434_s7 + $0x180] sm:$0xff]  ;;  %v1003_v16 = vld [vmem:[%s2436_s2 + $0x48] sm:$0xff]  ;;  %v997_v22 = vld [vmem:[%s2436_s2 + $0x18] sm:$0xff] }
  0x36   : > { %941 = vmatpush.msra.mxu1 %v885_v31  ;;  %988 = vmatpush.msra.mxu3 %v910_v58  ;;  %v831_v60 = vld [vmem:[%s2435_s30] sm:$0xf]  ;;  %v999_v20 = vld [vmem:[%s2436_s2 + $0x28] sm:$0xff]  ;;  %v996_v23 = vld [vmem:[%s2436_s2 + $0x10] sm:$0xff] }
  0x37   : > { %920 = vmatpush.msra.mxu0 %v870_v30  ;;  %961 = vmatpush.msra.mxu2 %v901_v32  ;;  %v833_v61 = vperm.slane %v831_v60, 0  ;;  %v834_v1 = vperm.slane %v831_v60, 1  ;;  %v835_v2 = vperm.slane %v831_v60, 2  ;;  %v836_v10 = vperm.slane %v831_v60, 3  ;;  %v1002_v17 = vld [vmem:[%s2436_s2 + $0x40] sm:$0xff]  ;;  %v995_v24 = vld [vmem:[%s2436_s2 + $0x8] sm:$0xff] }
  0x38   : > { %942 = vmatpush.msra.mxu1 %v884_v34  ;;  %989 = vmatpush.msra.mxu3 %v909_v59  ;;  %v998_v21 = vld [vmem:[%s2436_s2 + $0x20] sm:$0xff] }
  0x39   : > { %921 = vmatpush.msra.mxu0 %v869_v33  ;;  %962 = vmatpush.msra.mxu2 %v900_v35  ;;  %v994_v25 = vld [vmem:[%s2436_s2] sm:$0xff] }
  0x3a   : > { %943 = vmatpush.msra.mxu1 %v883_v37  ;;  %1014 = vmatpush.msrb.mxu3 %v1003_v16  ;;  %v1076_v37 = vld [vmem:[%s2437_s6 + $0x40] sm:$0xff] }
  0x3b   : > { %922 = vmatpush.msra.mxu0 %v868_v36  ;;  %963 = vmatpush.msra.mxu2 %v899_v41  ;;  %v1077_v36 = vld [vmem:[%s2437_s6 + $0x48] sm:$0xff]  ;;  %v1072_v41 = vld [vmem:[%s2437_s6 + $0x20] sm:$0xff] }
  0x3c   : > { %944 = vmatpush.msra.mxu1 %v882_v40  ;;  %1015 = vmatpush.msrb.mxu3 %v1002_v17  ;;  %v1073_v40 = vld [vmem:[%s2437_s6 + $0x28] sm:$0xff]  ;;  %v1064_v60 = vld [vmem:[%s2438_s27] sm:$0x1] }
  0x3d   : > { %923 = vmatpush.msra.mxu0 %v867_v38  ;;  %964 = vmatpush.msra.mxu2 %v898_v44  ;;  %v1075_v38 = vld [vmem:[%s2437_s6 + $0x38] sm:$0xff]  ;;  %v1069_v44 = vld [vmem:[%s2437_s6 + $0x8] sm:$0xff] }
  0x3e   : > { %945 = vmatpush.msra.mxu1 %v881_v43  ;;  %1016 = vmatpush.msrb.mxu3 %v1001_v18  ;;  %v1070_v43 = vld [vmem:[%s2437_s6 + $0x10] sm:$0xff] }
  0x3f   : > { %924 = vmatpush.msra.mxu0 %v866_v39  ;;  %965 = vmatpush.msra.mxu2 %v897_v47  ;;  %v1074_v39 = vld [vmem:[%s2437_s6 + $0x30] sm:$0xff] }
  0x40   : > { %946 = vmatpush.msra.mxu1 %v880_v46  ;;  %1017 = vmatpush.msrb.mxu3 %v1000_v19  ;;  %v1110_v46 = vld [vmem:[%s2403_s9 + $0x38] sm:$0xff]  ;;  %v1109_v47 = vld [vmem:[%s2403_s9 + $0x30] sm:$0xff] }
  0x41   : > { %925 = vmatpush.msra.mxu0 %v865_v42  ;;  %966 = vmatpush.msra.mxu2 %v896_v50  ;;  %v1071_v42 = vld [vmem:[%s2437_s6 + $0x18] sm:$0xff] }
  0x42   : > { %947 = vmatpush.msra.mxu1 %v879_v49  ;;  %1018 = vmatpush.msrb.mxu3 %v999_v20  ;;  %v1107_v49 = vld [vmem:[%s2403_s9 + $0x20] sm:$0xff] }
  0x43   : > { %926 = vmatpush.msra.mxu0 %v864_v45  ;;  %967 = vmatpush.msra.mxu2 %v895_v53  ;;  %v1068_v45 = vld [vmem:[%s2437_s6] sm:$0xff] }
  0x44   : > { %948 = vmatpush.msra.mxu1 %v878_v52  ;;  %1019 = vmatpush.msrb.mxu3 %v998_v21  ;;  %v1106_v52 = vld [vmem:[%s2403_s9 + $0x18] sm:$0xff] }
  0x45   : > { %927 = vmatpush.msra.mxu0 %v863_v48  ;;  %968 = vmatpush.msra.mxu2 %v894_v56  ;;  %v1108_v48 = vld [vmem:[%s2403_s9 + $0x28] sm:$0xff] }
  0x46   : > { %949 = vmatpush.msra.mxu1 %v877_v55  ;;  %1020 = vmatpush.msrb.mxu3 %v997_v22 }
  0x47   : > { %928 = vmatpush.msra.mxu0 %v862_v51  ;;  %969 = vmatpush.msra.mxu2 %v893_v57 }
  0x48   : > { %1021 = vmatpush.msrb.mxu3 %v996_v23  ;;  %1124 = vmatpush.msrb.mxu1 %v1110_v46  ;;  %v1212_v46 = vld [vmem:[%s2409_s15 + $0x28] sm:$0xff] }
  0x49   : > { %929 = vmatpush.msra.mxu0 %v861_v54 }
  0x4a   : > { %1022 = vmatpush.msrb.mxu3 %v995_v24  ;;  %1125 = vmatpush.msrb.mxu1 %v1109_v47  ;;  %v1211_v47 = vld [vmem:[%s2409_s15 + $0x20] sm:$0xff] }
  0x4b   : > { %1088 = vmatpush.msrb.mxu0 %v1077_v36  ;;  %v1222_v36 = vld [vmem:[%s2409_s15 + $0x78] sm:$0xff] }
  0x4c   : > { %1023 = vmatpush.msrb.mxu3 %v994_v25  ;;  %1126 = vmatpush.msrb.mxu1 %v1108_v48  ;;  %v1210_v48 = vld [vmem:[%s2409_s15 + $0x18] sm:$0xff] }
  0x4d   : > { %1089 = vmatpush.msrb.mxu0 %v1076_v37  ;;  %v1221_v37 = vld [vmem:[%s2409_s15 + $0x70] sm:$0xff] }
  0x4e   : > { %1127 = vmatpush.msrb.mxu1 %v1107_v49  ;;  %v1209_v49 = vld [vmem:[%s2409_s15 + $0x10] sm:$0xff] }
  0x4f   : > { %1090 = vmatpush.msrb.mxu0 %v1075_v38  ;;  %v1220_v38 = vld [vmem:[%s2409_s15 + $0x68] sm:$0xff] }
  0x50   : > { %1128 = vmatpush.msrb.mxu1 %v1106_v52 }
  0x51   : > { %1091 = vmatpush.msrb.mxu0 %v1074_v39  ;;  %v1219_v39 = vld [vmem:[%s2409_s15 + $0x60] sm:$0xff] }
  0x53   : > { %1092 = vmatpush.msrb.mxu0 %v1073_v40  ;;  %v1218_v40 = vld [vmem:[%s2409_s15 + $0x58] sm:$0xff] }
  0x55   : > { %1093 = vmatpush.msrb.mxu0 %v1072_v41  ;;  %v1217_v41 = vld [vmem:[%s2409_s15 + $0x50] sm:$0xff] }
  0x57   : > { %1094 = vmatpush.msrb.mxu0 %v1071_v42  ;;  %v1216_v42 = vld [vmem:[%s2409_s15 + $0x48] sm:$0xff] }
  0x59   : > { %1095 = vmatpush.msrb.mxu0 %v1070_v43  ;;  %v1215_v43 = vld [vmem:[%s2409_s15 + $0x40] sm:$0xff] }
  0x5b   : > { %1096 = vmatpush.msrb.mxu0 %v1069_v44  ;;  %v1214_v44 = vld [vmem:[%s2409_s15 + $0x38] sm:$0xff] }
  0x5d   : > { %1097 = vmatpush.msrb.mxu0 %v1068_v45  ;;  %v1213_v45 = vld [vmem:[%s2409_s15 + $0x30] sm:$0xff] }
  0xa3   : > { %v768_v62 = vpop.f32.mrf.mxu0 }
  0xa4   : > { %v841_v63 = vsub.f32 %v768_v62, %v833_v61  ;;  %v1066_v62 = vld [vmem:[%s2439_s29] sm:$0x1] }
  0xa6   : > { %v845_v0 = vand.u32 2147483647, %v841_v63 }
  0xa8   : > { %vm849_vm1 = vcmp.lt.f32.partialorder %v845_v0, 0.5 }
  0xa9   : > { %v788_v3 = vpop.f32.mrf.mxu3  ;;  %1553 = vmatmul.msk.f32.vlgmr.msra.gmra.mxu0 %vm849_vm1, %v1685_v4 }
  0xaa   : > { %v842_v5 = vsub.f32 %v788_v3, %v834_v1  ;;  %v1105_v1 = vld [vmem:[%s2403_s9 + $0x10] sm:$0xff]  ;;  %v1103_v3 = vld [vmem:[%s2403_s9] sm:$0xff] }
  0xab   : > { %v808_v6 = vpop.f32.mrf.mxu0  ;;  %1129 = vmatpush.msrb.mxu1 %v1105_v1  ;;  %v1246_v1 = vld [vmem:[#allocation2 + $0x8] sm:$0xff] }
  0xac   : > { %v846_v7 = vand.u32 2147483647, %v842_v5  ;;  %v843_v8 = vsub.f32 %v808_v6, %v835_v2  ;;  %v1104_v2 = vld [vmem:[%s2403_s9 + $0x8] sm:$0xff]  ;;  %v1143_v5 = vld [vmem:[%s2405_s11 + $0x30] sm:$0xff] }
  0xad   : > { %1130 = vmatpush.msrb.mxu1 %v1104_v2  ;;  %v1142_v6 = vld [vmem:[%s2405_s11 + $0x28] sm:$0xff]  ;;  %v1245_v2 = vld [vmem:[#allocation2] sm:$0xff] }
  0xae   : > { %vm850_vm2 = vcmp.lt.f32.partialorder %v846_v7, 0.5  ;;  %v847_v9 = vand.u32 2147483647, %v843_v8  ;;  %v1141_v7 = vld [vmem:[%s2405_s11 + $0x20] sm:$0xff]  ;;  %v1140_v8 = vld [vmem:[%s2405_s11 + $0x18] sm:$0xff] }
  0xaf   : > { %1554 = vmatmul.msk.f32.vlgmr.msra.gmra.mxu1 %vm850_vm2, %v1685_v4 }
  0xb0   : > { %vm851_vm3 = vcmp.lt.f32.partialorder %v847_v9, 0.5  ;;  %1131 = vmatpush.msrb.mxu1 %v1103_v3  ;;  %v1078_v9 = vld [vmem:[%s2402_s8] sm:$0x1]  ;;  %v1285_v3 = vld [vmem:[#allocation4 + $0x38] sm:$0xff] }
  0xb1   : > { %v828_v11 = vpop.f32.mrf.mxu3  ;;  %1555 = vmatmul.msk.f32.vlgmr.msra.gmra.mxu2 %vm851_vm3, %v1685_v4  ;;  %v1144_v4 = vld [vmem:[%s2405_s11 + $0x38] sm:$0xff]  ;;  %1298 = vmatpush.msra.mxu0 %v1285_v3 }
  0xb2   : > { %v844_v12 = vsub.f32 %v828_v11, %v836_v10  ;;  %1157 = vmatpush.msrb.mxu2 %v1144_v4  ;;  %v1284_v4 = vld [vmem:[#allocation4 + $0x30] sm:$0xff] }
  0xb3   : > { %1299 = vmatpush.msra.mxu0 %v1284_v4 }
  0xb4   : > { %v848_v13 = vand.u32 2147483647, %v844_v12  ;;  %1158 = vmatpush.msrb.mxu2 %v1143_v5  ;;  %v1283_v5 = vld [vmem:[#allocation4 + $0x28] sm:$0xff] }
  0xb5   : > { %1300 = vmatpush.msra.mxu0 %v1283_v5 }
  0xb6   : > { %vm852_vm4 = vcmp.lt.f32.partialorder %v848_v13, 0.5  ;;  %1159 = vmatpush.msrb.mxu2 %v1142_v6  ;;  %v1139_v13 = vld [vmem:[%s2405_s11 + $0x10] sm:$0xff]  ;;  %v1282_v6 = vld [vmem:[#allocation4 + $0x20] sm:$0xff] }
  0xb7   : > { %v1552_v15 = vsel %vm852_vm4, 1.0, %v1686_v14  ;;  %v1138_v14 = vld [vmem:[%s2405_s11 + $0x8] sm:$0xff]  ;;  %1301 = vmatpush.msra.mxu0 %v1282_v6 }
  0xb8   : > { %1556 = vmatmul.msk.f32.vlgmr.msra.gmra.mxu3 %vm747_vm0, %v1552_v15  ;;  %1160 = vmatpush.msrb.mxu2 %v1141_v7  ;;  %v1137_v15 = vld [vmem:[%s2405_s11] sm:$0xff]  ;;  %v1281_v7 = vld [vmem:[#allocation4 + $0x18] sm:$0xff] }
  0xb9   : > { %1039 = vmatpush.msra.mxu3 %v1003_v16  ;;  %v1185_v16 = vld [vmem:[%s2407_s13 + $0x78] sm:$0xff]  ;;  %1302 = vmatpush.msra.mxu0 %v1281_v7 }
  0xba   : > { %1161 = vmatpush.msrb.mxu2 %v1140_v8  ;;  %1187 = vmatpush.msra.mxu1 %v1185_v16  ;;  %v1223_v8 = vld [vmem:[%s2410_s16] sm:$0x1]  ;;  %v1348_v16 = vld [vmem:[%s2415_s21 + $0x128] sm:$0xff] }
  0xbb   : > { %1040 = vmatpush.msra.mxu3 %v1002_v17  ;;  %v1184_v17 = vld [vmem:[%s2407_s13 + $0x70] sm:$0xff] }
  0xbc   : > { %1162 = vmatpush.msrb.mxu2 %v1139_v13  ;;  %1188 = vmatpush.msra.mxu1 %v1184_v17  ;;  %v1279_v13 = vld [vmem:[#allocation4 + $0x8] sm:$0xff]  ;;  %v1349_v17 = vld [vmem:[%s2415_s21 + $0x130] sm:$0xff] }
  0xbd   : > { %1041 = vmatpush.msra.mxu3 %v1001_v18  ;;  %v1183_v18 = vld [vmem:[%s2407_s13 + $0x68] sm:$0xff] }
  0xbe   : > { %1163 = vmatpush.msrb.mxu2 %v1138_v14  ;;  %1189 = vmatpush.msra.mxu1 %v1183_v18  ;;  %v1278_v14 = vld [vmem:[#allocation4] sm:$0xff]  ;;  %v1350_v18 = vld [vmem:[%s2415_s21 + $0x138] sm:$0xff] }
  0xbf   : > { %1042 = vmatpush.msra.mxu3 %v1000_v19  ;;  %v1182_v19 = vld [vmem:[%s2407_s13 + $0x60] sm:$0xff] }
  0xc0   : > { %1164 = vmatpush.msrb.mxu2 %v1137_v15  ;;  %1190 = vmatpush.msra.mxu1 %v1182_v19  ;;  %v1347_v15 = vld [vmem:[%s2415_s21 + $0x120] sm:$0xff] }
  0xc1   : > { %1043 = vmatpush.msra.mxu3 %v999_v20  ;;  %v1181_v20 = vld [vmem:[%s2407_s13 + $0x58] sm:$0xff]  ;;  %v1343_v19 = vld [vmem:[%s2415_s21 + $0x100] sm:$0xff] }
  0xc2   : > { %1191 = vmatpush.msra.mxu1 %v1181_v20  ;;  %1224 = vmatpush.msra.mxu2 %v1222_v36  ;;  %v1344_v20 = vld [vmem:[%s2415_s21 + $0x108] sm:$0xff] }
  0xc3   : > { %1044 = vmatpush.msra.mxu3 %v998_v21  ;;  %v1180_v21 = vld [vmem:[%s2407_s13 + $0x50] sm:$0xff]  ;;  %v1328_v36 = vld [vmem:[%s2415_s21 + $0x88] sm:$0xff] }
  0xc4   : > { %1192 = vmatpush.msra.mxu1 %v1180_v21  ;;  %1225 = vmatpush.msra.mxu2 %v1221_v37  ;;  %v1345_v21 = vld [vmem:[%s2415_s21 + $0x110] sm:$0xff] }
  0xc5   : > { %1045 = vmatpush.msra.mxu3 %v997_v22  ;;  %v1179_v22 = vld [vmem:[%s2407_s13 + $0x48] sm:$0xff]  ;;  %v1329_v37 = vld [vmem:[%s2415_s21 + $0x90] sm:$0xff] }
  0xc6   : > { %1193 = vmatpush.msra.mxu1 %v1179_v22  ;;  %1226 = vmatpush.msra.mxu2 %v1220_v38  ;;  %v1346_v22 = vld [vmem:[%s2415_s21 + $0x118] sm:$0xff] }
  0xc7   : > { %1046 = vmatpush.msra.mxu3 %v996_v23  ;;  %v1178_v23 = vld [vmem:[%s2407_s13 + $0x40] sm:$0xff]  ;;  %v1330_v38 = vld [vmem:[%s2415_s21 + $0x98] sm:$0xff] }
  0xc8   : > { %1194 = vmatpush.msra.mxu1 %v1178_v23  ;;  %1227 = vmatpush.msra.mxu2 %v1219_v39  ;;  %v1339_v23 = vld [vmem:[%s2415_s21 + $0xe0] sm:$0xff] }
  0xc9   : > { %1047 = vmatpush.msra.mxu3 %v995_v24  ;;  %v1177_v24 = vld [vmem:[%s2407_s13 + $0x38] sm:$0xff]  ;;  %v1323_v39 = vld [vmem:[%s2415_s21 + $0x60] sm:$0xff] }
  0xca   : > { %1195 = vmatpush.msra.mxu1 %v1177_v24  ;;  %1228 = vmatpush.msra.mxu2 %v1218_v40  ;;  %v1340_v24 = vld [vmem:[%s2415_s21 + $0xe8] sm:$0xff] }
  0xcb   : > { %1048 = vmatpush.msra.mxu3 %v994_v25  ;;  %v1176_v25 = vld [vmem:[%s2407_s13 + $0x30] sm:$0xff]  ;;  %v1324_v40 = vld [vmem:[%s2415_s21 + $0x68] sm:$0xff] }
  0xcc   : > { %1196 = vmatpush.msra.mxu1 %v1176_v25  ;;  %1229 = vmatpush.msra.mxu2 %v1217_v41  ;;  %v1341_v25 = vld [vmem:[%s2415_s21 + $0xf0] sm:$0xff] }
  0xcd   : > { %v1325_v41 = vld [vmem:[%s2415_s21 + $0x70] sm:$0xff] }
  0xce   : > { %1230 = vmatpush.msra.mxu2 %v1216_v42  ;;  %v1326_v42 = vld [vmem:[%s2415_s21 + $0x78] sm:$0xff] }
  0xd0   : > { %1231 = vmatpush.msra.mxu2 %v1215_v43  ;;  %v1253_v43 = vld [vmem:[%s2412_s18] sm:$0x1] }
  0xd2   : > { %1232 = vmatpush.msra.mxu2 %v1214_v44 }
  0xd4   : > { %1233 = vmatpush.msra.mxu2 %v1213_v45 }
  0xd6   : > { %1234 = vmatpush.msra.mxu2 %v1212_v46 }
  0xd8   : > { %1235 = vmatpush.msra.mxu2 %v1211_v47  ;;  %v1319_v47 = vld [vmem:[%s2415_s21 + $0x40] sm:$0xff] }
  0xda   : > { %1236 = vmatpush.msra.mxu2 %v1210_v48  ;;  %v1320_v48 = vld [vmem:[%s2415_s21 + $0x48] sm:$0xff] }
  0xdc   : > { %1237 = vmatpush.msra.mxu2 %v1209_v49  ;;  %v1321_v49 = vld [vmem:[%s2415_s21 + $0x50] sm:$0xff] }
 0x126   : > { %v931_v26 = vpop.f32.mrf.mxu0 }
 0x12c   : > { %v951_v27 = vpop.f32.mrf.mxu1 }
 0x12d   : > { %v952_v29 = vadd.f32 %v951_v27, %v931_v26  ;;  %v1175_v26 = vld [vmem:[%s2407_s13 + $0x28] sm:$0xff]  ;;  %v1174_v27 = vld [vmem:[%s2407_s13 + $0x20] sm:$0xff] }
 0x12e   : > { %1197 = vmatpush.msra.mxu1 %v1175_v26  ;;  %v1342_v26 = vld [vmem:[%s2415_s21 + $0xf8] sm:$0xff] }
 0x130   : > { %1198 = vmatpush.msra.mxu1 %v1174_v27  ;;  %v1335_v27 = vld [vmem:[%s2415_s21 + $0xc0] sm:$0xff] }
 0x134   : > { %v971_v28 = vpop.f32.mrf.mxu2 }
 0x135   : > { %v972_v30 = vadd.f32 %v971_v28, %v952_v29  ;;  %v1173_v28 = vld [vmem:[%s2407_s13 + $0x18] sm:$0xff]  ;;  %v1111_v29 = vld [vmem:[%s2404_s10] sm:$0x1] }
 0x136   : > { %1199 = vmatpush.msra.mxu1 %v1173_v28  ;;  %v1336_v28 = vld [vmem:[%s2415_s21 + $0xc8] sm:$0xff] }
 0x13b   : > { %v991_v31 = vpop.f32.mrf.mxu3 }
 0x13c   : > { %v992_v32 = vadd.f32 %v991_v31, %v972_v30 }
 0x13e   : > { %1557 = vmatmul.msk.f32.vlgmr.msrb.gmra.mxu3 %vm1004_vm5, %v992_v32 }
 0x1c1   : > { %v1025_v33 = vpop.f32.mrf.mxu3 }
 0x1c2   : > { %v1028_v34 = vsub.f32 %v992_v32, %v1025_v33  ;;  %v1172_v33 = vld [vmem:[%s2407_s13 + $0x10] sm:$0xff] }
 0x1c3   : > { %1200 = vmatpush.msra.mxu1 %v1172_v33  ;;  %v1333_v33 = vld [vmem:[%s2415_s21 + $0xb0] sm:$0xff] }
 0x1c4   : > { %v1029_v35 = vmul.f32 %v1028_v34, %v1028_v34 }
 0x1c6   : > { %1558 = vmatmul.msk.f32.vlgmr.msra.gmra.mxu3 %vm1004_vm5, %v1029_v35  ;;  %v1170_v35 = vld [vmem:[%s2407_s13] sm:$0xff] }
 0x249   : > { %v1050_v50 = vpop.f32.mrf.mxu3 }
 0x24a   : > { %v1051_v51 = vadd.f32 1e-05, %v1050_v50  ;;  %v1145_v50 = vld [vmem:[%s2406_s12] sm:$0x1] }
 0x24c   : > { %1603 = vrsqrt.f32 %v1051_v51  ;;  %vm1059_vm7 = vweird.f32 %v1051_v51 }
 0x252   : > { %v1604_v53 = vpop.eup %1603 }
 0x253   : > { %v1054_v54 = vmul.f32 %v1604_v53, %v1051_v51  ;;  %vm1060_vm6 = vweird.f32 %v1604_v53 }
 0x254   : > { %vm1061_vm8 = vmor %vm1059_vm7, %vm1060_vm6 }
 0x255   : > { %v1055_v55 = vmul.f32 %v1604_v53, %v1054_v54  ;;  %v1208_v54 = vld [vmem:[%s2409_s15 + $0x8] sm:$0xff] }
 0x256   : > { %1238 = vmatpush.msra.mxu2 %v1208_v54  ;;  %v1318_v54 = vld [vmem:[%s2415_s21 + $0x38] sm:$0xff] }
 0x257   : > { %v1056_v56 = vmul.f32 0.5, %v1055_v55  ;;  %v1207_v55 = vld [vmem:[%s2409_s15] sm:$0xff] }
 0x258   : > { %1239 = vmatpush.msra.mxu2 %v1207_v55  ;;  %v1311_v55 = vld [vmem:[%s2415_s21] sm:$0xff] }
 0x259   : > { %v1057_v57 = vsub.f32 1.5, %v1056_v56  ;;  %v1252_v56 = vld [vmem:[#allocation2 + $0x38] sm:$0xff] }
 0x25a   : > { %1265 = vmatpush.msrb.mxu3 %v1252_v56  ;;  %v1312_v56 = vld [vmem:[%s2415_s21 + $0x8] sm:$0xff] }
 0x25b   : > { %v1058_v58 = vmul.f32 %v1604_v53, %v1057_v57  ;;  %v1251_v57 = vld [vmem:[#allocation2 + $0x30] sm:$0xff] }
 0x25c   : > { %1266 = vmatpush.msrb.mxu3 %v1251_v57  ;;  %v1313_v57 = vld [vmem:[%s2415_s21 + $0x10] sm:$0xff] }
 0x25d   : > { %v1062_v59 = vsel %vm1061_vm8, %v1604_v53, %v1058_v58  ;;  %v1250_v58 = vld [vmem:[#allocation2 + $0x28] sm:$0xff] }
 0x25e   : > { %v1063_v61 = vmul.f32 %v1062_v59, %v1028_v34  ;;  %v1171_v34 = vld [vmem:[%s2407_s13 + $0x8] sm:$0xff]  ;;  %v1249_v59 = vld [vmem:[#allocation2 + $0x20] sm:$0xff]  ;;  %1267 = vmatpush.msrb.mxu3 %v1250_v58  ;;  %v1314_v58 = vld [vmem:[%s2415_s21 + $0x18] sm:$0xff] }
 0x25f   : > { %1201 = vmatpush.msra.mxu1 %v1171_v34  ;;  %v1334_v34 = vld [vmem:[%s2415_s21 + $0xb8] sm:$0xff] }
 0x260   : > { %v1065_v63 = vmul.f32 %v1064_v60, %v1063_v61  ;;  %v1248_v60 = vld [vmem:[#allocation2 + $0x18] sm:$0xff]  ;;  %1268 = vmatpush.msrb.mxu3 %v1249_v59  ;;  %v1186_v61 = vld [vmem:[%s2408_s14] sm:$0x1] }
 0x261   : > { %1202 = vmatpush.msra.mxu1 %v1170_v35  ;;  %v1327_v35 = vld [vmem:[%s2415_s21 + $0x80] sm:$0xff] }
 0x262   : > { %v1067_v0 = vadd.f32 %v1066_v62, %v1065_v63  ;;  %1269 = vmatpush.msrb.mxu3 %v1248_v60  ;;  %v1286_v59 = vld [vmem:[%s2414_s20] sm:$0x1] }
 0x264   : > { %1559 = vmatmul.msk.f32.vlgmr.msrb.gmra.mxu0 %vm1004_vm5, %v1067_v0  ;;  %v1247_v0 = vld [vmem:[#allocation2 + $0x10] sm:$0xff] }
 0x265   : > { %1270 = vmatpush.msrb.mxu3 %v1247_v0 }
 0x267   : > { %1271 = vmatpush.msrb.mxu3 %v1246_v1 }
 0x269   : > { %1272 = vmatpush.msrb.mxu3 %v1245_v2 }
 0x26b   : > { %1370 = vmatpush.msra.mxu3 %v1347_v15 }
 0x26d   : > { %1371 = vmatpush.msra.mxu3 %v1343_v19 }
 0x26f   : > { %1372 = vmatpush.msra.mxu3 %v1339_v23 }
 0x271   : > { %1373 = vmatpush.msra.mxu3 %v1335_v27 }
 0x2e1   : > { %v1099_v10 = vpop.f32.mrf.mxu0 }
 0x2e2   : > { %v1100_v11 = vadd.f32 %v1099_v10, %v1078_v9 }
 0x2e4   : > { %v1102_v12 = vmax.f32 %v1100_v11, 0.0 }
 0x2e6   : > { %1560 = vmatmul.msk.f32.vlgmr.msrb.gmra.mxu1 %vm1112_vm9, %v1102_v12  ;;  %v1280_v12 = vld [vmem:[#allocation4 + $0x10] sm:$0xff] }
 0x2e7   : > { %1303 = vmatpush.msra.mxu0 %v1280_v12  ;;  %1410 = vmatpush.msrb.mxu1 %v1349_v17 }
 0x2e9   : > { %1304 = vmatpush.msra.mxu0 %v1279_v13  ;;  %1411 = vmatpush.msrb.mxu1 %v1345_v21 }
 0x2eb   : > { %1305 = vmatpush.msra.mxu0 %v1278_v14  ;;  %1412 = vmatpush.msrb.mxu1 %v1341_v25 }
 0x2ed   : > { %1390 = vmatpush.msrb.mxu0 %v1348_v16 }
 0x2ef   : > { %1391 = vmatpush.msrb.mxu0 %v1344_v20 }
 0x2f1   : > { %1392 = vmatpush.msrb.mxu0 %v1340_v24 }
 0x2f3   : > { %1393 = vmatpush.msrb.mxu0 %v1336_v28 }
 0x363   : > { %v1133_v30 = vpop.f32.mrf.mxu1 }
 0x364   : > { %v1134_v31 = vadd.f32 %v1133_v30, %v1111_v29  ;;  %v1337_v29 = vld [vmem:[%s2415_s21 + $0xd0] sm:$0xff]  ;;  %v1338_v30 = vld [vmem:[%s2415_s21 + $0xd8] sm:$0xff] }
 0x365   : > { %1413 = vmatpush.msrb.mxu1 %v1337_v29 }
 0x366   : > { %v1136_v32 = vmax.f32 %v1134_v31, 0.0  ;;  %v1331_v31 = vld [vmem:[%s2415_s21 + $0xa0] sm:$0xff] }
 0x367   : > { %1374 = vmatpush.msra.mxu3 %v1331_v31  ;;  %1414 = vmatpush.msrb.mxu1 %v1333_v33 }
 0x368   : > { %1561 = vmatmul.msk.f32.vlgmr.msrb.gmra.mxu2 %vm1112_vm9, %v1136_v32  ;;  %v1332_v32 = vld [vmem:[%s2415_s21 + $0xa8] sm:$0xff] }
 0x369   : > { %1430 = vmatpush.msrb.mxu2 %v1350_v18  ;;  %1394 = vmatpush.msrb.mxu0 %v1332_v32 }
 0x36a   : > { %1375 = vmatpush.msra.mxu3 %v1327_v35  ;;  %1415 = vmatpush.msrb.mxu1 %v1329_v37 }
 0x36b   : > { %1431 = vmatpush.msrb.mxu2 %v1346_v22  ;;  %1395 = vmatpush.msrb.mxu0 %v1328_v36 }
 0x36c   : > { %1376 = vmatpush.msra.mxu3 %v1323_v39  ;;  %1416 = vmatpush.msrb.mxu1 %v1325_v41 }
 0x36d   : > { %1432 = vmatpush.msrb.mxu2 %v1342_v26  ;;  %1396 = vmatpush.msrb.mxu0 %v1324_v40 }
 0x36e   : > { %1377 = vmatpush.msra.mxu3 %v1319_v47  ;;  %1417 = vmatpush.msrb.mxu1 %v1321_v49 }
 0x36f   : > { %1433 = vmatpush.msrb.mxu2 %v1338_v30  ;;  %1397 = vmatpush.msrb.mxu0 %v1320_v48 }
 0x371   : > { %1434 = vmatpush.msrb.mxu2 %v1334_v34 }
 0x373   : > { %1435 = vmatpush.msrb.mxu2 %v1330_v38 }
 0x375   : > { %1436 = vmatpush.msrb.mxu2 %v1326_v42 }
 0x3eb   : > { %v1166_v51 = vpop.f32.mrf.mxu2 }
 0x3ec   : > { %v1167_v52 = vadd.f32 %v1166_v51, %v1145_v50  ;;  %v1322_v50 = vld [vmem:[%s2415_s21 + $0x58] sm:$0xff]  ;;  %v1315_v51 = vld [vmem:[%s2415_s21 + $0x20] sm:$0xff] }
 0x3ed   : > { %1437 = vmatpush.msrb.mxu2 %v1322_v50  ;;  %1378 = vmatpush.msra.mxu3 %v1315_v51 }
 0x3ee   : > { %v1169_v53 = vmax.f32 %v1167_v52, 0.0  ;;  %v1316_v52 = vld [vmem:[%s2415_s21 + $0x28] sm:$0xff] }
 0x3ef   : > { %1398 = vmatpush.msrb.mxu0 %v1316_v52  ;;  %1438 = vmatpush.msrb.mxu2 %v1318_v54 }
 0x3f0   : > { %1203 = vmatmul.f32.vlgmr.msra.gmra.mxu1 %v1169_v53  ;;  %v1317_v53 = vld [vmem:[%s2415_s21 + $0x30] sm:$0xff]  ;;  %1379 = vmatpush.msra.mxu3 %v1311_v55 }
 0x3f1   : > { %1418 = vmatpush.msrb.mxu1 %v1317_v53  ;;  %1399 = vmatpush.msrb.mxu0 %v1312_v56 }
 0x3f2   : > { %1439 = vmatpush.msrb.mxu2 %v1314_v58 }
 0x3f3   : > { %1419 = vmatpush.msrb.mxu1 %v1313_v57 }
 0x46d   : > { %v1204_v62 = vpop.f32.mrf.mxu1 }
 0x46e   : > { %v1205_v63 = vadd.f32 %v1204_v62, %v1186_v61 }
 0x470   : > { %1240 = vmatmul.f32.vlgmr.msra.gmra.mxu2 %v1205_v63  ;;  %v1351_v63 = vld [vmem:[%s2416_s22] sm:$0xf] }
 0x471   : > { %v1354_v0 = vperm.slane %v1351_v63, 1  ;;  %v1355_v1 = vperm.slane %v1351_v63, 2  ;;  %v1353_v4 = vperm.slane %v1351_v63, 0  ;;  %v1356_v5 = vperm.slane %v1351_v63, 3 }
 0x4f3   : > { %v1241_v9 = vpop.f32.mrf.mxu2 }
 0x4f4   : > { %v1242_v10 = vadd.f32 %v1241_v9, %v1223_v8 }
 0x4f6   : > { %v1244_v11 = vmax.f32 %v1242_v10, 0.0  ;;  %v1458_v10 = vlaneseq }
 0x4f8   : > { %1562 = vmatmul.msk.f32.vlgmr.msrb.gmra.mxu3 %vm1112_vm9, %v1244_v11  ;;  %vm1460_vm13 = vcmp.lt.s32.totalorder %v1458_v10, 512 }
 0x57b   : > { %v1274_v44 = vpop.f32.mrf.mxu3 }
 0x57c   : > { %v1275_v45 = vadd.f32 %v1274_v44, %v1253_v43 }
 0x57e   : > { %v1277_v46 = vmax.f32 %v1275_v45, 0.0 }
 0x580   : > { %1563 = vmatmul.msk.f32.vlgmr.msra.gmra.mxu0 %vm1112_vm9, %v1277_v46 }
 0x5fd   : > { %v1307_v60 = vpop.f32.mrf.mxu0 }
 0x5fe   : > { %v1308_v61 = vadd.f32 %v1307_v60, %v1286_v59 }
 0x600   : > { %v1310_v62 = vmax.f32 %v1308_v61, 0.0 }
 0x602   : > { %1564 = vmatmul.msk.f32.vlgmr.msra.gmra.mxu3 %vm1004_vm5, %v1310_v62  ;;  %1565 = vmatmul.msk.f32.vlgmr.msrb.gmra.mxu0 %vm1004_vm5, %v1310_v62 }
 0x603   : > { %1566 = vmatmul.msk.f32.vlgmr.msrb.gmra.mxu1 %vm1004_vm5, %v1310_v62  ;;  %1567 = vmatmul.msk.f32.vlgmr.msrb.gmra.mxu2 %vm1004_vm5, %v1310_v62 }
 0x67f   : > { %v1401_v2 = vpop.f32.mrf.mxu0 }
 0x680   : > { %v1421_v3 = vpop.f32.mrf.mxu1  ;;  %v1402_v6 = vadd.f32 %v1401_v2, %v1354_v0 }
 0x681   : > { %v1422_v7 = vadd.f32 %v1421_v3, %v1355_v1 }
 0x682   : > { %v1448_v13 = vrot.slane %v1402_v6, 7 }
 0x683   : > { %v1449_v14 = vrot.slane %v1422_v7, 6 }
 0x685   : > { %v1381_v8 = vpop.f32.mrf.mxu3 }
 0x686   : > { %v1441_v9 = vpop.f32.mrf.mxu2  ;;  %v1382_v11 = vadd.f32 %v1381_v8, %v1353_v4 }
 0x687   : > { %v1442_v12 = vadd.f32 %v1441_v9, %v1356_v5 }
 0x688   : > { %v1452_v16 = vsel %vm1451_vm10, %v1382_v11, %v1448_v13 }
 0x689   : > { %v1450_v15 = vrot.slane %v1442_v12, 5 }
 0x68b   : > { %v1454_v17 = vsel %vm1453_vm11, %v1449_v14, %v1450_v15 }
 0x68c   : > { %v1456_v18 = vsel %vm1455_vm12, %v1452_v16, %v1454_v17 }
 0x68d   : > { %1462 = vst.msk [vmem:[%s736_s26] sm:$0xf] %vm1460_vm13, %v1456_v18 }
 0x68e PF: > { %s35_s4 = sadd.s32 1, %s1679_s4  }
 0x68f   : > { %p32_p7 = scmp.ge.s32.totalorder %s35_s4, 4  }
 0x691   :  { %34 = sbr.rel (!%p32_p7) target bundleno = 11 (0xb), region = 151 }
 0x696   :  { %1482 = vsyncpa [#allocation3], 1 }
 0x697   :  { %1484 = vsyncpa [#allocation3 + $0x1], 1 }
 0x698   :  { %1485 = vsyncpa [#allocation5], 1 }

</bundles_post_ra>
